<compile_context>
chip_gen: v7x
topology: tpu7x:2x2x1
jax: 0.10.0
libtpu: 0.0.40
codegen_flags: <defaults>
</compile_context>

<pallas_src>
import functools

import jax
import jax.numpy as jnp
from jax import lax
from jax.experimental import pallas as pl
from jax.experimental.pallas import tpu as pltpu

LANE = 128
SUBLANE = 8
MXU_DTYPE = jnp.bfloat16        # MXU operand dtype (f32 accumulate / elementwise)


def _round_up(x, m):
    return ((x + m - 1) // m) * m


def _pad_to(x, shape):
    pads = [(0, s - d) for d, s in zip(x.shape, shape)]
    return jnp.pad(x, pads)


def _pick_chunk(T, cap=32):
    """Largest divisor of T that is <= cap (timesteps per grid iteration)."""
    k = min(cap, T)
    while T % k:
        k -= 1
    return k


# ----------------------------------------------------------------------------
# Pallas kernels
# ----------------------------------------------------------------------------
def make_rnn_kernel(K, emit_all):
    """Recurrence kernel processing K timesteps per grid iteration.

    Grid: (batch_shards, T // K).  Batch-shard axis is "parallel" (v7x: one
    shard per TensorCore), the time-chunk axis is "arbitrary" (serial).

    xproj_ref: (K, Bs, H_pad)   bf16, precomputed x_t @ Wih + b for the chunk
    whh_ref:   (H_pad, H_pad)   bf16, resident (same block index every step)
    out_ref:   emit_all -> (Bs, K*H_pad) batch-major trajectory slab (bf16)
               else     -> (Bs, H_pad)   final hidden state only (bf16)
    h_ref:     (Bs, H_pad) f32 persistent scratch carrying h across chunks
    """

    def kernel(xproj_ref, whh_ref, out_ref, h_ref):
        H_pad = whh_ref.shape[0]

        @pl.when(pl.program_id(1) == 0)
        def _():
            h_ref[...] = jnp.zeros_like(h_ref)

        # Static unroll over the K timesteps of this chunk.
        for k in range(K):
            h_new = jnp.tanh(
                xproj_ref[k].astype(jnp.float32)
                + jnp.dot(h_ref[...].astype(MXU_DTYPE), whh_ref[...],
                          preferred_element_type=jnp.float32))
            h_ref[...] = h_new
            if emit_all:
                out_ref[:, k * H_pad:(k + 1) * H_pad] = h_new.astype(out_ref.dtype)

        if not emit_all:
            # Classify path: only the final hidden state ever leaves the kernel.
            @pl.when(pl.program_id(1) == pl.num_programs(1) - 1)
            def _():
                out_ref[...] = h_ref[...].astype(out_ref.dtype)

    return kernel


def linear_kernel(x_ref, w_ref, b_ref, o_ref):
    """o = x @ W + b on one (rows, cols) tile (bf16 operands, f32 accumulate)."""
    o_ref[...] = (
        jnp.dot(x_ref[...], w_ref[...], preferred_element_type=jnp.float32)
        + b_ref[...]
    ).astype(o_ref.dtype)


# ----------------------------------------------------------------------------
# Wrappers
# ----------------------------------------------------------------------------
def linear_forward(x2d, w_t, bias, *, out_dtype=jnp.float32,
                   row_cap=512, col_cap=512):
    """Tiled (rows, cols) linear layer: (R, F) @ (F, O) + (1, O)."""
    R, F = x2d.shape
    O = w_t.shape[1]

    # Row (sublane) padding & tile size.
    Rp = _round_up(max(R, SUBLANE), SUBLANE)
    if Rp <= row_cap:
        tr = Rp
    else:
        Rp = _round_up(Rp, row_cap)
        tr = row_cap

    # Column (lane) tile size; O is already a multiple of 128.
    tc = O
    for cand in (col_cap, 256, 128):
        if cand <= O and O % cand == 0:
            tc = cand
            break

    x_p = _pad_to(x2d, (Rp, F)) if Rp != R else x2d
    nr, nc = Rp // tr, O // tc

    # Order the grid so the LARGER operand's block index is constant across
    # the inner axis: it stays resident in VMEM and is not re-streamed from
    # HBM every inner step (important for the vocab-sized generator weight).
    w_bytes = F * O * w_t.dtype.itemsize
    x_bytes = Rp * F * x_p.dtype.itemsize
    if w_bytes >= x_bytes:
        grid = (nc, nr)                                   # cols outer, rows inner
        x_spec = pl.BlockSpec((tr, F), lambda j, i: (i, 0))
        w_spec = pl.BlockSpec((F, tc), lambda j, i: (0, j))   # fixed over inner i
        b_spec = pl.BlockSpec((1, tc), lambda j, i: (0, j))
        o_spec = pl.BlockSpec((tr, tc), lambda j, i: (i, j))
    else:
        grid = (nr, nc)                                   # rows outer, cols inner
        x_spec = pl.BlockSpec((tr, F), lambda i, j: (i, 0))   # fixed over inner j
        w_spec = pl.BlockSpec((F, tc), lambda i, j: (0, j))
        b_spec = pl.BlockSpec((1, tc), lambda i, j: (0, j))
        o_spec = pl.BlockSpec((tr, tc), lambda i, j: (i, j))

    out = pl.pallas_call(
        linear_kernel,
        out_shape=jax.ShapeDtypeStruct((Rp, O), out_dtype),
        grid_spec=pltpu.PrefetchScalarGridSpec(
            num_scalar_prefetch=0,
            grid=grid,
            in_specs=[x_spec, w_spec, b_spec],
            out_specs=o_spec,
        ),
        compiler_params=pltpu.CompilerParams(
            dimension_semantics=("parallel", "parallel")),
    )(x_p, w_t, bias)
    return out[:R] if Rp != R else out


def rnn_forward(xproj_3d, whh_p, *, emit_all):
    """Chunked, batch-sharded recurrence.

    xproj_3d: (T, B_pad, H_pad) bf16 (time-major precomputed x@Wih + b)
    whh_p:    (H_pad, H_pad)    bf16
    Returns (B_pad, T*H_pad) batch-major trajectory (emit_all) or
            (B_pad, H_pad) final hidden state.
    """
    T, B_pad, H_pad = xproj_3d.shape
    K = _pick_chunk(T)
    Tc = T // K
    # Split the batch across TensorCores (v7x megacore) when possible.
    S = 2 if (B_pad % (2 * SUBLANE) == 0) else 1
    Bs = B_pad // S

    if emit_all:
        out_shape = jax.ShapeDtypeStruct((B_pad, T * H_pad), MXU_DTYPE)
        out_spec = pl.BlockSpec((Bs, K * H_pad), lambda s, c: (s, c))
    else:
        out_shape = jax.ShapeDtypeStruct((B_pad, H_pad), MXU_DTYPE)
        out_spec = pl.BlockSpec((Bs, H_pad), lambda s, c: (s, 0))

    return pl.pallas_call(
        make_rnn_kernel(K, emit_all),
        out_shape=out_shape,
        grid_spec=pltpu.PrefetchScalarGridSpec(
            num_scalar_prefetch=0,
            grid=(S, Tc),
            in_specs=[
                # chunk of precomputed xWih: timesteps [c*K, (c+1)*K), batch shard s
                pl.BlockSpec((K, Bs, H_pad), lambda s, c: (c, s, 0)),
                # Whh resident across all steps
                pl.BlockSpec((H_pad, H_pad), lambda s, c: (0, 0)),
            ],
            out_specs=out_spec,
            scratch_shapes=[pltpu.VMEM((Bs, H_pad), jnp.float32)],
        ),
        compiler_params=pltpu.CompilerParams(
            dimension_semantics=("parallel", "arbitrary")),
    )(xproj_3d, whh_p)


@functools.partial(jax.jit, static_argnames=("task", "num_classes", "vocab_size"))
def multitask_rnn_forward(kp, x_idx, *, task, num_classes, vocab_size):
    """Forward pass mirroring MultiTaskRNN.forward.  x_idx: (B, T) int32."""
    B, T = x_idx.shape
    B_pad = _round_up(max(B, SUBLANE), SUBLANE)

    # Pad batch, go time-major via the tiny int index array (not the big
    # activation tensor), then gather padded bf16 embeddings: (T, B_pad, E_pad).
    idx = jnp.pad(x_idx, ((0, B_pad - B), (0, 0)))
    idx_tb = idx.T
    x_emb = jnp.take(kp["embedding_p"], idx_tb, axis=0)
    E_pad = x_emb.shape[-1]
    H_pad = kp["w_hh_t_p"].shape[0]

    # Hoisted input projection for ALL timesteps in one big MXU matmul
    # (bias b_ih + b_hh folded in here, off the serial path); stored bf16.
    xproj = linear_forward(
        x_emb.reshape(T * B_pad, E_pad), kp["w_ih_t_p"], kp["rnn_bias_p"],
        out_dtype=MXU_DTYPE)
    xproj = xproj.reshape(T, B_pad, H_pad)

    if task == "classify":
        h_last = rnn_forward(xproj, kp["w_hh_t_p"], emit_all=False)  # (B_pad, H_pad)
        logits = linear_forward(h_last, kp["w_cls_t_p"], kp["b_cls_p"])
        return logits[:B, :num_classes]
    elif task == "generate":
        # Kernel already emits the trajectory batch-major: (B_pad, T*H_pad).
        hid = rnn_forward(xproj, kp["w_hh_t_p"], emit_all=True)
        hid_bt = hid.reshape(B_pad * T, H_pad)                # free reshape, no transpose
        logits = linear_forward(hid_bt, kp["w_gen_t_p"], kp["b_gen_p"])
        return logits.reshape(B_pad, T, -1)[:B, :, :vocab_size]
    else:
        raise ValueError("Invalid task type")


# ----------------------------------------------------------------------------
# Parameters (PyTorch-shaped raw params + padded/transposed kernel params)
# ----------------------------------------------------------------------------
def init_params(key, vocab_size, embed_dim, hidden_dim, num_classes):
    ks = jax.random.split(key, 9)
    s = 0.1
    return {
        "embedding": s * jax.random.normal(ks[0], (vocab_size, embed_dim), jnp.float32),
        "w_ih": s * jax.random.normal(ks[1], (hidden_dim, embed_dim), jnp.float32),
        "w_hh": s * jax.random.normal(ks[2], (hidden_dim, hidden_dim), jnp.float32),
        "b_ih": s * jax.random.normal(ks[3], (hidden_dim,), jnp.float32),
        "b_hh": s * jax.random.normal(ks[4], (hidden_dim,), jnp.float32),
        "w_cls": s * jax.random.normal(ks[5], (num_classes, hidden_dim), jnp.float32),
        "b_cls": s * jax.random.normal(ks[6], (num_classes,), jnp.float32),
        "w_gen": s * jax.random.normal(ks[7], (vocab_size, hidden_dim), jnp.float32),
        "b_gen": s * jax.random.normal(ks[8], (vocab_size,), jnp.float32),
    }


def prepare_kernel_params(raw):
    """Pre-transpose weights, zero-pad feature dims to lane width (128) and
    store MXU operands as bf16 (f32 accumulate / bias keeps elementwise f32).
    Zero padding keeps the real lanes consistent with the unpadded math."""
    V, E = raw["embedding"].shape
    H = raw["w_hh"].shape[0]
    C = raw["w_cls"].shape[0]
    E_pad, H_pad = _round_up(E, LANE), _round_up(H, LANE)
    C_pad, V_pad = _round_up(C, LANE), _round_up(V, LANE)
    return {
        "embedding_p": _pad_to(raw["embedding"], (V, E_pad)).astype(MXU_DTYPE),
        "w_ih_t_p": _pad_to(raw["w_ih"].T, (E_pad, H_pad)).astype(MXU_DTYPE),
        "w_hh_t_p": _pad_to(raw["w_hh"].T, (H_pad, H_pad)).astype(MXU_DTYPE),
        "rnn_bias_p": _pad_to((raw["b_ih"] + raw["b_hh"])[None, :], (1, H_pad)),
        "w_cls_t_p": _pad_to(raw["w_cls"].T, (H_pad, C_pad)).astype(MXU_DTYPE),
        "b_cls_p": _pad_to(raw["b_cls"][None, :], (1, C_pad)),
        "w_gen_t_p": _pad_to(raw["w_gen"].T, (H_pad, V_pad)).astype(MXU_DTYPE),
        "b_gen_p": _pad_to(raw["b_gen"][None, :], (1, V_pad)),
    }


# ----------------------------------------------------------------------------
# Pure-JAX f32 reference (sanity check against the unpadded parameters)
# ----------------------------------------------------------------------------
def reference_forward(raw, x_idx, task):
    x_emb = jnp.take(raw["embedding"], x_idx, axis=0)      # (B, T, E)
    B, T, _ = x_emb.shape
    H = raw["w_hh"].shape[0]
    w_ih_t, w_hh_t = raw["w_ih"].T, raw["w_hh"].T
    bias = raw["b_ih"] + raw["b_hh"]

    def step(h, x_t):
        h_new = jnp.tanh(x_t @ w_ih_t + h @ w_hh_t + bias)
        return h_new, h_new

    h0 = jnp.zeros((B, H), jnp.float32)
    _, hs = lax.scan(step, h0, jnp.transpose(x_emb, (1, 0, 2)))
    hidden = jnp.transpose(hs, (1, 0, 2))
    if task == "classify":
        return hidden[:, -1, :] @ raw["w_cls"].T + raw["b_cls"]
    else:
        return hidden @ raw["w_gen"].T + raw["b_gen"]


if __name__ == "__main__":
    vocab_size, embed_dim, hidden_dim, num_classes = 32, 16, 32, 8
    B, T = 2, 8

    key = jax.random.PRNGKey(0)
    k_params, k_x = jax.random.split(key)
    raw = init_params(k_params, vocab_size, embed_dim, hidden_dim, num_classes)
    kp = prepare_kernel_params(raw)
    x_idx = jax.random.randint(k_x, (B, T), 0, vocab_size, dtype=jnp.int32)

    cls_out = multitask_rnn_forward(kp, x_idx, task="classify",
                                    num_classes=num_classes, vocab_size=vocab_size)
    gen_out = multitask_rnn_forward(kp, x_idx, task="generate",
                                    num_classes=num_classes, vocab_size=vocab_size)
    jax.block_until_ready((cls_out, gen_out))

    assert cls_out.shape == (B, num_classes)
    assert gen_out.shape == (B, T, vocab_size)

    # Kernel uses bf16 MXU operands (f32 accumulate); reference is pure f32,
    # so allow bf16-level tolerance (outputs here are O(0.1-0.5)).
    cls_ref = reference_forward(raw, x_idx, "classify")
    gen_ref = reference_forward(raw, x_idx, "generate")
    assert jnp.allclose(cls_out, cls_ref, atol=5e-3, rtol=5e-3)
    assert jnp.allclose(gen_out, gen_ref, atol=5e-3, rtol=5e-3)

    print("KERNEL_OK")
</pallas_src>

<mosaic_0001>
module attributes {stable_mosaic.version = 11 : i64} {
  func.func @linear_kernel(%arg0: i32, %arg1: i32, %arg2: memref<8x128xbf16, #tpu.memory_space<vmem>>, %arg3: memref<128x128xbf16, #tpu.memory_space<vmem>>, %arg4: memref<1x128xf32, #tpu.memory_space<vmem>>, %arg5: memref<8x128xf32, #tpu.memory_space<vmem>>) attributes {dimension_semantics = [#tpu.dimension_semantics<parallel>, #tpu.dimension_semantics<parallel>], iteration_bounds = array<i64: 1, 1>, scalar_prefetch = 0 : i64, scratch_operands = 0 : i64, tpu.core_type = #tpu.core_type<tc>, window_params = [{transform_indices = @transform_0, window_bounds = array<i64: 8, 128>}, {transform_indices = @transform_1, window_bounds = array<i64: 128, 128>}, {transform_indices = @transform_2, window_bounds = array<i64: 1, 128>}, {transform_indices = @transform_3, window_bounds = array<i64: 8, 128>}]} {
    %c0 = arith.constant 0 : index
    %c0_0 = arith.constant 0 : index
    %0 = vector.load %arg2[%c0, %c0_0] : memref<8x128xbf16, #tpu.memory_space<vmem>>, vector<8x128xbf16>
    %c0_1 = arith.constant 0 : index
    %c0_2 = arith.constant 0 : index
    %1 = vector.load %arg3[%c0_1, %c0_2] : memref<128x128xbf16, #tpu.memory_space<vmem>>, vector<128x128xbf16>
    %cst = arith.constant dense<0.000000e+00> : vector<8x128xf32>
    %2 = tpu.matmul %0, %1, %cst {dimension_numbers = #tpu.dot_dimension_numbers<[1], [0], [0], [1], [0, 0, 1, 1], [], []>} : vector<8x128xbf16>, vector<128x128xbf16>, vector<8x128xf32> -> vector<8x128xf32>
    %c0_3 = arith.constant 0 : index
    %c0_4 = arith.constant 0 : index
    %3 = vector.load %arg4[%c0_3, %c0_4] : memref<1x128xf32, #tpu.memory_space<vmem>>, vector<1x128xf32>
    %4 = vector.broadcast %3 : vector<1x128xf32> to vector<8x128xf32>
    %5 = arith.addf %2, %4 : vector<8x128xf32>
    %c0_5 = arith.constant 0 : index
    %c0_6 = arith.constant 0 : index
    %6 = vector.load %arg5[%c0_5, %c0_6] : memref<8x128xf32, #tpu.memory_space<vmem>>, vector<8x128xf32>
    tpu.vector_store %arg5[%c0_5, %c0_6], %5 {strides = array<i32>} : memref<8x128xf32, #tpu.memory_space<vmem>>, vector<8x128xf32>,
    return
  }
  func.func @transform_0(%arg0: i32, %arg1: i32) -> (i32, i32) {
    %c0_i32 = arith.constant 0 : i32
    %c0_i32_0 = arith.constant 0 : i32
    return %arg1, %c0_i32 : i32, i32
  }
  func.func @transform_1(%arg0: i32, %arg1: i32) -> (i32, i32) {
    %c0_i32 = arith.constant 0 : i32
    %c0_i32_0 = arith.constant 0 : i32
    return %c0_i32, %arg0 : i32, i32
  }
  func.func @transform_2(%arg0: i32, %arg1: i32) -> (i32, i32) {
    %c0_i32 = arith.constant 0 : i32
    %c0_i32_0 = arith.constant 0 : i32
    return %c0_i32, %arg0 : i32, i32
  }
  func.func @transform_3(%arg0: i32, %arg1: i32) -> (i32, i32) {
    %c0_i32 = arith.constant 0 : i32
    return %arg1, %arg0 : i32, i32
  }
}

module attributes {stable_mosaic.version = 11 : i64} {
  func.func @linear_kernel(%arg0: i32, %arg1: i32, %arg2: memref<64x128xbf16, #tpu.memory_space<vmem>>, %arg3: memref<128x128xbf16, #tpu.memory_space<vmem>>, %arg4: memref<1x128xf32, #tpu.memory_space<vmem>>, %arg5: memref<64x128xbf16, #tpu.memory_space<vmem>>) attributes {dimension_semantics = [#tpu.dimension_semantics<parallel>, #tpu.dimension_semantics<parallel>], iteration_bounds = array<i64: 1, 1>, scalar_prefetch = 0 : i64, scratch_operands = 0 : i64, tpu.core_type = #tpu.core_type<tc>, window_params = [{transform_indices = @transform_0, window_bounds = array<i64: 64, 128>}, {transform_indices = @transform_1, window_bounds = array<i64: 128, 128>}, {transform_indices = @transform_2, window_bounds = array<i64: 1, 128>}, {transform_indices = @transform_3, window_bounds = array<i64: 64, 128>}]} {
    %c0 = arith.constant 0 : index
    %c0_0 = arith.constant 0 : index
    %0 = vector.load %arg2[%c0, %c0_0] : memref<64x128xbf16, #tpu.memory_space<vmem>>, vector<64x128xbf16>
    %c0_1 = arith.constant 0 : index
    %c0_2 = arith.constant 0 : index
    %1 = vector.load %arg3[%c0_1, %c0_2] : memref<128x128xbf16, #tpu.memory_space<vmem>>, vector<128x128xbf16>
    %cst = arith.constant dense<0.000000e+00> : vector<64x128xf32>
    %2 = tpu.matmul %0, %1, %cst {dimension_numbers = #tpu.dot_dimension_numbers<[1], [0], [0], [1], [0, 0, 1, 1], [], []>} : vector<64x128xbf16>, vector<128x128xbf16>, vector<64x128xf32> -> vector<64x128xf32>
    %c0_3 = arith.constant 0 : index
    %c0_4 = arith.constant 0 : index
    %3 = vector.load %arg4[%c0_3, %c0_4] : memref<1x128xf32, #tpu.memory_space<vmem>>, vector<1x128xf32>
    %4 = vector.broadcast %3 : vector<1x128xf32> to vector<64x128xf32>
    %5 = arith.addf %2, %4 : vector<64x128xf32>
    %6 = arith.truncf %5 : vector<64x128xf32> to vector<64x128xbf16>
    %c0_5 = arith.constant 0 : index
    %c0_6 = arith.constant 0 : index
    %7 = vector.load %arg5[%c0_5, %c0_6] : memref<64x128xbf16, #tpu.memory_space<vmem>>, vector<64x128xbf16>
    tpu.vector_store %arg5[%c0_5, %c0_6], %6 {strides = array<i32>} : memref<64x128xbf16, #tpu.memory_space<vmem>>, vector<64x128xbf16>,
    return
  }
  func.func @transform_0(%arg0: i32, %arg1: i32) -> (i32, i32) {
    %c0_i32 = arith.constant 0 : i32
    %c0_i32_0 = arith.constant 0 : i32
    return %arg1, %c0_i32 : i32, i32
  }
  func.func @transform_1(%arg0: i32, %arg1: i32) -> (i32, i32) {
    %c0_i32 = arith.constant 0 : i32
    %c0_i32_0 = arith.constant 0 : i32
    return %c0_i32, %arg0 : i32, i32
  }
  func.func @transform_2(%arg0: i32, %arg1: i32) -> (i32, i32) {
    %c0_i32 = arith.constant 0 : i32
    %c0_i32_0 = arith.constant 0 : i32
    return %c0_i32, %arg0 : i32, i32
  }
  func.func @transform_3(%arg0: i32, %arg1: i32) -> (i32, i32) {
    %c0_i32 = arith.constant 0 : i32
    return %arg1, %arg0 : i32, i32
  }
}

module attributes {stable_mosaic.version = 11 : i64} {
  func.func @kernel(%arg0: i32, %arg1: i32, %arg2: memref<8x8x128xbf16, #tpu.memory_space<vmem>>, %arg3: memref<128x128xbf16, #tpu.memory_space<vmem>>, %arg4: memref<8x128xbf16, #tpu.memory_space<vmem>>, %arg5: memref<8x128xf32, #tpu.memory_space<vmem>>) attributes {dimension_semantics = [#tpu.dimension_semantics<parallel>, #tpu.dimension_semantics<arbitrary>], iteration_bounds = array<i64: 1, 1>, scalar_prefetch = 0 : i64, scratch_operands = 1 : i64, tpu.core_type = #tpu.core_type<tc>, window_params = [{transform_indices = @transform_0, window_bounds = array<i64: 8, 8, 128>}, {pipeline_mode = #tpu.pipeline_mode<synchronous>, transform_indices = @transform_1, window_bounds = array<i64: 128, 128>}, {transform_indices = @transform_2, window_bounds = array<i64: 8, 128>}]} {
    %c0_i32 = arith.constant 0 : i32
    %0 = arith.cmpi eq, %arg1, %c0_i32 : i32
    %1 = arith.extui %0 : i1 to i32
    %c0_i32_0 = arith.constant 0 : i32
    %2 = arith.cmpi ne, %1, %c0_i32_0 : i32
    scf.if %2 {
      %cst_74 = arith.constant 0.000000e+00 : f32
      %86 = vector.broadcast %cst_74 : f32 to vector<8x128xf32>
      %c0_75 = arith.constant 0 : index
      %c0_76 = arith.constant 0 : index
      %87 = vector.load %arg5[%c0_75, %c0_76] : memref<8x128xf32, #tpu.memory_space<vmem>>, vector<8x128xf32>
      tpu.vector_store %arg5[%c0_75, %c0_76], %86 {strides = array<i32>} : memref<8x128xf32, #tpu.memory_space<vmem>>, vector<8x128xf32>,
    } else {
    }
    %c0 = arith.constant 0 : index
    %c0_1 = arith.constant 0 : index
    %c0_2 = arith.constant 0 : index
    %3 = vector.load %arg2[%c0, %c0_1, %c0_2] : memref<8x8x128xbf16, #tpu.memory_space<vmem>>, vector<1x8x128xbf16>
    %4 = vector.shape_cast %3 : vector<1x8x128xbf16> to vector<8x128xbf16>
    %5 = arith.extf %4 : vector<8x128xbf16> to vector<8x128xf32>
    %c0_3 = arith.constant 0 : index
    %c0_4 = arith.constant 0 : index
    %6 = vector.load %arg5[%c0_3, %c0_4] : memref<8x128xf32, #tpu.memory_space<vmem>>, vector<8x128xf32>
    %7 = arith.truncf %6 : vector<8x128xf32> to vector<8x128xbf16>
    %c0_5 = arith.constant 0 : index
    %c0_6 = arith.constant 0 : index
    %8 = vector.load %arg3[%c0_5, %c0_6] : memref<128x128xbf16, #tpu.memory_space<vmem>>, vector<128x128xbf16>
    %cst = arith.constant dense<0.000000e+00> : vector<8x128xf32>
    %9 = tpu.matmul %7, %8, %cst {dimension_numbers = #tpu.dot_dimension_numbers<[1], [0], [0], [1], [0, 0, 1, 1], [], []>} : vector<8x128xbf16>, vector<128x128xbf16>, vector<8x128xf32> -> vector<8x128xf32>
    %10 = arith.addf %5, %9 : vector<8x128xf32>
    %11 = math.tanh %10 : vector<8x128xf32>
    %c0_7 = arith.constant 0 : index
    %c0_8 = arith.constant 0 : index
    %12 = vector.load %arg5[%c0_7, %c0_8] : memref<8x128xf32, #tpu.memory_space<vmem>>, vector<8x128xf32>
    tpu.vector_store %arg5[%c0_7, %c0_8], %11 {strides = array<i32>} : memref<8x128xf32, #tpu.memory_space<vmem>>, vector<8x128xf32>,
    %c1 = arith.constant 1 : index
    %c0_9 = arith.constant 0 : index
    %c0_10 = arith.constant 0 : index
    %13 = vector.load %arg2[%c1, %c0_9, %c0_10] : memref<8x8x128xbf16, #tpu.memory_space<vmem>>, vector<1x8x128xbf16>
    %14 = vector.shape_cast %13 : vector<1x8x128xbf16> to vector<8x128xbf16>
    %15 = arith.extf %14 : vector<8x128xbf16> to vector<8x128xf32>
    %c0_11 = arith.constant 0 : index
    %c0_12 = arith.constant 0 : index
    %16 = vector.load %arg5[%c0_11, %c0_12] : memref<8x128xf32, #tpu.memory_space<vmem>>, vector<8x128xf32>
    %17 = arith.truncf %16 : vector<8x128xf32> to vector<8x128xbf16>
    %c0_13 = arith.constant 0 : index
    %c0_14 = arith.constant 0 : index
    %18 = vector.load %arg3[%c0_13, %c0_14] : memref<128x128xbf16, #tpu.memory_space<vmem>>, vector<128x128xbf16>
    %cst_15 = arith.constant dense<0.000000e+00> : vector<8x128xf32>
    %19 = tpu.matmul %17, %18, %cst_15 {dimension_numbers = #tpu.dot_dimension_numbers<[1], [0], [0], [1], [0, 0, 1, 1], [], []>} : vector<8x128xbf16>, vector<128x128xbf16>, vector<8x128xf32> -> vector<8x128xf32>
    %20 = arith.addf %15, %19 : vector<8x128xf32>
    %21 = math.tanh %20 : vector<8x128xf32>
    %c0_16 = arith.constant 0 : index
    %c0_17 = arith.constant 0 : index
    %22 = vector.load %arg5[%c0_16, %c0_17] : memref<8x128xf32, #tpu.memory_space<vmem>>, vector<8x128xf32>
    tpu.vector_store %arg5[%c0_16, %c0_17], %21 {strides = array<i32>} : memref<8x128xf32, #tpu.memory_space<vmem>>, vector<8x128xf32>,
    %c2 = arith.constant 2 : index
    %c0_18 = arith.constant 0 : index
    %c0_19 = arith.constant 0 : index
    %23 = vector.load %arg2[%c2, %c0_18, %c0_19] : memref<8x8x128xbf16, #tpu.memory_space<vmem>>, vector<1x8x128xbf16>
    %24 = vector.shape_cast %23 : vector<1x8x128xbf16> to vector<8x128xbf16>
    %25 = arith.extf %24 : vector<8x128xbf16> to vector<8x128xf32>
    %c0_20 = arith.constant 0 : index
    %c0_21 = arith.constant 0 : index
    %26 = vector.load %arg5[%c0_20, %c0_21] : memref<8x128xf32, #tpu.memory_space<vmem>>, vector<8x128xf32>
    %27 = arith.truncf %26 : vector<8x128xf32> to vector<8x128xbf16>
    %c0_22 = arith.constant 0 : index
    %c0_23 = arith.constant 0 : index
    %28 = vector.load %arg3[%c0_22, %c0_23] : memref<128x128xbf16, #tpu.memory_space<vmem>>, vector<128x128xbf16>
    %cst_24 = arith.constant dense<0.000000e+00> : vector<8x128xf32>
    %29 = tpu.matmul %27, %28, %cst_24 {dimension_numbers = #tpu.dot_dimension_numbers<[1], [0], [0], [1], [0, 0, 1, 1], [], []>} : vector<8x128xbf16>, vector<128x128xbf16>, vector<8x128xf32> -> vector<8x128xf32>
    %30 = arith.addf %25, %29 : vector<8x128xf32>
    %31 = math.tanh %30 : vector<8x128xf32>
    %c0_25 = arith.constant 0 : index
    %c0_26 = arith.constant 0 : index
    %32 = vector.load %arg5[%c0_25, %c0_26] : memref<8x128xf32, #tpu.memory_space<vmem>>, vector<8x128xf32>
    tpu.vector_store %arg5[%c0_25, %c0_26], %31 {strides = array<i32>} : memref<8x128xf32, #tpu.memory_space<vmem>>, vector<8x128xf32>,
    %c3 = arith.constant 3 : index
    %c0_27 = arith.constant 0 : index
    %c0_28 = arith.constant 0 : index
    %33 = vector.load %arg2[%c3, %c0_27, %c0_28] : memref<8x8x128xbf16, #tpu.memory_space<vmem>>, vector<1x8x128xbf16>
    %34 = vector.shape_cast %33 : vector<1x8x128xbf16> to vector<8x128xbf16>
    %35 = arith.extf %34 : vector<8x128xbf16> to vector<8x128xf32>
    %c0_29 = arith.constant 0 : index
    %c0_30 = arith.constant 0 : index
    %36 = vector.load %arg5[%c0_29, %c0_30] : memref<8x128xf32, #tpu.memory_space<vmem>>, vector<8x128xf32>
    %37 = arith.truncf %36 : vector<8x128xf32> to vector<8x128xbf16>
    %c0_31 = arith.constant 0 : index
    %c0_32 = arith.constant 0 : index
    %38 = vector.load %arg3[%c0_31, %c0_32] : memref<128x128xbf16, #tpu.memory_space<vmem>>, vector<128x128xbf16>
    %cst_33 = arith.constant dense<0.000000e+00> : vector<8x128xf32>
    %39 = tpu.matmul %37, %38, %cst_33 {dimension_numbers = #tpu.dot_dimension_numbers<[1], [0], [0], [1], [0, 0, 1, 1], [], []>} : vector<8x128xbf16>, vector<128x128xbf16>, vector<8x128xf32> -> vector<8x128xf32>
    %40 = arith.addf %35, %39 : vector<8x128xf32>
    %41 = math.tanh %40 : vector<8x128xf32>
    %c0_34 = arith.constant 0 : index
    %c0_35 = arith.constant 0 : index
    %42 = vector.load %arg5[%c0_34, %c0_35] : memref<8x128xf32, #tpu.memory_space<vmem>>, vector<8x128xf32>
    tpu.vector_store %arg5[%c0_34, %c0_35], %41 {strides = array<i32>} : memref<8x128xf32, #tpu.memory_space<vmem>>, vector<8x128xf32>,
    %c4 = arith.constant 4 : index
    %c0_36 = arith.constant 0 : index
    %c0_37 = arith.constant 0 : index
    %43 = vector.load %arg2[%c4, %c0_36, %c0_37] : memref<8x8x128xbf16, #tpu.memory_space<vmem>>, vector<1x8x128xbf16>
    %44 = vector.shape_cast %43 : vector<1x8x128xbf16> to vector<8x128xbf16>
    %45 = arith.extf %44 : vector<8x128xbf16> to vector<8x128xf32>
    %c0_38 = arith.constant 0 : index
    %c0_39 = arith.constant 0 : index
    %46 = vector.load %arg5[%c0_38, %c0_39] : memref<8x128xf32, #tpu.memory_space<vmem>>, vector<8x128xf32>
    %47 = arith.truncf %46 : vector<8x128xf32> to vector<8x128xbf16>
    %c0_40 = arith.constant 0 : index
    %c0_41 = arith.constant 0 : index
    %48 = vector.load %arg3[%c0_40, %c0_41] : memref<128x128xbf16, #tpu.memory_space<vmem>>, vector<128x128xbf16>
    %cst_42 = arith.constant dense<0.000000e+00> : vector<8x128xf32>
    %49 = tpu.matmul %47, %48, %cst_42 {dimension_numbers = #tpu.dot_dimension_numbers<[1], [0], [0], [1], [0, 0, 1, 1], [], []>} : vector<8x128xbf16>, vector<128x128xbf16>, vector<8x128xf32> -> vector<8x128xf32>
    %50 = arith.addf %45, %49 : vector<8x128xf32>
    %51 = math.tanh %50 : vector<8x128xf32>
    %c0_43 = arith.constant 0 : index
    %c0_44 = arith.constant 0 : index
    %52 = vector.load %arg5[%c0_43, %c0_44] : memref<8x128xf32, #tpu.memory_space<vmem>>, vector<8x128xf32>
    tpu.vector_store %arg5[%c0_43, %c0_44], %51 {strides = array<i32>} : memref<8x128xf32, #tpu.memory_space<vmem>>, vector<8x128xf32>,
    %c5 = arith.constant 5 : index
    %c0_45 = arith.constant 0 : index
    %c0_46 = arith.constant 0 : index
    %53 = vector.load %arg2[%c5, %c0_45, %c0_46] : memref<8x8x128xbf16, #tpu.memory_space<vmem>>, vector<1x8x128xbf16>
    %54 = vector.shape_cast %53 : vector<1x8x128xbf16> to vector<8x128xbf16>
    %55 = arith.extf %54 : vector<8x128xbf16> to vector<8x128xf32>
    %c0_47 = arith.constant 0 : index
    %c0_48 = arith.constant 0 : index
    %56 = vector.load %arg5[%c0_47, %c0_48] : memref<8x128xf32, #tpu.memory_space<vmem>>, vector<8x128xf32>
    %57 = arith.truncf %56 : vector<8x128xf32> to vector<8x128xbf16>
    %c0_49 = arith.constant 0 : index
    %c0_50 = arith.constant 0 : index
    %58 = vector.load %arg3[%c0_49, %c0_50] : memref<128x128xbf16, #tpu.memory_space<vmem>>, vector<128x128xbf16>
    %cst_51 = arith.constant dense<0.000000e+00> : vector<8x128xf32>
    %59 = tpu.matmul %57, %58, %cst_51 {dimension_numbers = #tpu.dot_dimension_numbers<[1], [0], [0], [1], [0, 0, 1, 1], [], []>} : vector<8x128xbf16>, vector<128x128xbf16>, vector<8x128xf32> -> vector<8x128xf32>
    %60 = arith.addf %55, %59 : vector<8x128xf32>
    %61 = math.tanh %60 : vector<8x128xf32>
    %c0_52 = arith.constant 0 : index
    %c0_53 = arith.constant 0 : index
    %62 = vector.load %arg5[%c0_52, %c0_53] : memref<8x128xf32, #tpu.memory_space<vmem>>, vector<8x128xf32>
    tpu.vector_store %arg5[%c0_52, %c0_53], %61 {strides = array<i32>} : memref<8x128xf32, #tpu.memory_space<vmem>>, vector<8x128xf32>,
    %c6 = arith.constant 6 : index
    %c0_54 = arith.constant 0 : index
    %c0_55 = arith.constant 0 : index
    %63 = vector.load %arg2[%c6, %c0_54, %c0_55] : memref<8x8x128xbf16, #tpu.memory_space<vmem>>, vector<1x8x128xbf16>
    %64 = vector.shape_cast %63 : vector<1x8x128xbf16> to vector<8x128xbf16>
    %65 = arith.extf %64 : vector<8x128xbf16> to vector<8x128xf32>
    %c0_56 = arith.constant 0 : index
    %c0_57 = arith.constant 0 : index
    %66 = vector.load %arg5[%c0_56, %c0_57] : memref<8x128xf32, #tpu.memory_space<vmem>>, vector<8x128xf32>
    %67 = arith.truncf %66 : vector<8x128xf32> to vector<8x128xbf16>
    %c0_58 = arith.constant 0 : index
    %c0_59 = arith.constant 0 : index
    %68 = vector.load %arg3[%c0_58, %c0_59] : memref<128x128xbf16, #tpu.memory_space<vmem>>, vector<128x128xbf16>
    %cst_60 = arith.constant dense<0.000000e+00> : vector<8x128xf32>
    %69 = tpu.matmul %67, %68, %cst_60 {dimension_numbers = #tpu.dot_dimension_numbers<[1], [0], [0], [1], [0, 0, 1, 1], [], []>} : vector<8x128xbf16>, vector<128x128xbf16>, vector<8x128xf32> -> vector<8x128xf32>
    %70 = arith.addf %65, %69 : vector<8x128xf32>
    %71 = math.tanh %70 : vector<8x128xf32>
    %c0_61 = arith.constant 0 : index
    %c0_62 = arith.constant 0 : index
    %72 = vector.load %arg5[%c0_61, %c0_62] : memref<8x128xf32, #tpu.memory_space<vmem>>, vector<8x128xf32>
    tpu.vector_store %arg5[%c0_61, %c0_62], %71 {strides = array<i32>} : memref<8x128xf32, #tpu.memory_space<vmem>>, vector<8x128xf32>,
    %c7 = arith.constant 7 : index
    %c0_63 = arith.constant 0 : index
    %c0_64 = arith.constant 0 : index
    %73 = vector.load %arg2[%c7, %c0_63, %c0_64] : memref<8x8x128xbf16, #tpu.memory_space<vmem>>, vector<1x8x128xbf16>
    %74 = vector.shape_cast %73 : vector<1x8x128xbf16> to vector<8x128xbf16>
    %75 = arith.extf %74 : vector<8x128xbf16> to vector<8x128xf32>
    %c0_65 = arith.constant 0 : index
    %c0_66 = arith.constant 0 : index
    %76 = vector.load %arg5[%c0_65, %c0_66] : memref<8x128xf32, #tpu.memory_space<vmem>>, vector<8x128xf32>
    %77 = arith.truncf %76 : vector<8x128xf32> to vector<8x128xbf16>
    %c0_67 = arith.constant 0 : index
    %c0_68 = arith.constant 0 : index
    %78 = vector.load %arg3[%c0_67, %c0_68] : memref<128x128xbf16, #tpu.memory_space<vmem>>, vector<128x128xbf16>
    %cst_69 = arith.constant dense<0.000000e+00> : vector<8x128xf32>
    %79 = tpu.matmul %77, %78, %cst_69 {dimension_numbers = #tpu.dot_dimension_numbers<[1], [0], [0], [1], [0, 0, 1, 1], [], []>} : vector<8x128xbf16>, vector<128x128xbf16>, vector<8x128xf32> -> vector<8x128xf32>
    %80 = arith.addf %75, %79 : vector<8x128xf32>
    %81 = math.tanh %80 : vector<8x128xf32>
    %c0_70 = arith.constant 0 : index
    %c0_71 = arith.constant 0 : index
    %82 = vector.load %arg5[%c0_70, %c0_71] : memref<8x128xf32, #tpu.memory_space<vmem>>, vector<8x128xf32>
    tpu.vector_store %arg5[%c0_70, %c0_71], %81 {strides = array<i32>} : memref<8x128xf32, #tpu.memory_space<vmem>>, vector<8x128xf32>,
    %c0_i32_72 = arith.constant 0 : i32
    %83 = arith.cmpi eq, %arg1, %c0_i32_72 : i32
    %84 = arith.extui %83 : i1 to i32
    %c0_i32_73 = arith.constant 0 : i32
    %85 = arith.cmpi ne, %84, %c0_i32_73 : i32
    scf.if %85 {
      %c0_74 = arith.constant 0 : index
      %c0_75 = arith.constant 0 : index
      %86 = vector.load %arg5[%c0_74, %c0_75] : memref<8x128xf32, #tpu.memory_space<vmem>>, vector<8x128xf32>
      %87 = arith.truncf %86 : vector<8x128xf32> to vector<8x128xbf16>
      %c0_76 = arith.constant 0 : index
      %c0_77 = arith.constant 0 : index
      %88 = vector.load %arg4[%c0_76, %c0_77] : memref<8x128xbf16, #tpu.memory_space<vmem>>, vector<8x128xbf16>
      tpu.vector_store %arg4[%c0_76, %c0_77], %87 {strides = array<i32>} : memref<8x128xbf16, #tpu.memory_space<vmem>>, vector<8x128xbf16>,
    } else {
    }
    return
  }
  func.func @transform_0(%arg0: i32, %arg1: i32) -> (i32, i32, i32) {
    %c0_i32 = arith.constant 0 : i32
    %c0_i32_0 = arith.constant 0 : i32
    return %arg1, %arg0, %c0_i32 : i32, i32, i32
  }
  func.func @transform_1(%arg0: i32, %arg1: i32) -> (i32, i32) {
    %c0_i32 = arith.constant 0 : i32
    %c0_i32_0 = arith.constant 0 : i32
    %c0_i32_1 = arith.constant 0 : i32
    return %c0_i32, %c0_i32_0 : i32, i32
  }
  func.func @transform_2(%arg0: i32, %arg1: i32) -> (i32, i32) {
    %c0_i32 = arith.constant 0 : i32
    %c0_i32_0 = arith.constant 0 : i32
    return %arg0, %c0_i32 : i32, i32
  }
}

</mosaic_0001>

<bundles_post_ra>
// kernel: multitask_rnn_forward.5
= control target key start
LH: loop header
LB: loop body
LE: loop exit
PB: predicated region body
PF: predicated region fallthrough
CT: control target
= control target key end

     0   :  { %v180_v0 = vmov 0.0   ;;  %vm181_vm0 = vmmov 0   ;;  %s235_s1 = inlined_call_operand.vmem [shape: bf16[128,128], index: 1, kind: input, shape index: {}]   ;;  %s236_s0 = inlined_call_operand.vmem [shape: bf16[8,128], index: 0, kind: input, shape index: {}]   ;;  %s237_s2 = inlined_call_operand.vmem [shape: f32[1,128], index: 2, kind: input, shape index: {}]   ;;  %s238_s3 = inlined_call_operand.vmem [shape: f32[8,128], index: 3, kind: output, shape index: {}]  }
   0x1   :  { %150 = vmatprep.subr.bf16.mxu0 %v180_v0  ;;  %v172_v1 = vld [vmem:[%s235_s1] sm:$0xff]   ;;  %166 = vmatprep.mubr.msk.bf16.mxu0 %vm181_vm0, %v180_v0  ;;  %v173_v2 = vld [vmem:[%s235_s1 + $0x8] sm:$0xff]   ;;  %v174_v3 = vld [vmem:[%s235_s1 + $0x10] sm:$0xff]  }
   0x2   :  { %151 = vmatpush3.bf16.msra.mxu0 %v172_v1  ;;  %v175_v4 = vld [vmem:[%s235_s1 + $0x18] sm:$0xff]   ;;  %v176_v5 = vld [vmem:[%s235_s1 + $0x20] sm:$0xff]   ;;  %v177_v6 = vld [vmem:[%s235_s1 + $0x28] sm:$0xff]  }
   0x3   :  { %152 = vmatprep.subr.bf16.mxu0 %v180_v0  ;;  %v178_v7 = vld [vmem:[%s235_s1 + $0x30] sm:$0xff]   ;;  %v179_v8 = vld [vmem:[%s235_s1 + $0x38] sm:$0xff]   ;;  %v15_v9 = vld [vmem:[%s236_s0] sm:$0xf] }
   0x4   :  { %v132_v10 = vld [vmem:[%s237_s2] ss:$0 sm:$0xff] }
   0x6   :  { %153 = vmatpush3.bf16.msra.mxu0 %v173_v2 }
   0x7   :  { %154 = vmatprep.subr.bf16.mxu0 %v180_v0 }
   0xa   :  { %155 = vmatpush3.bf16.msra.mxu0 %v174_v3 }
   0xb   :  { %156 = vmatprep.subr.bf16.mxu0 %v180_v0 }
   0xe   :  { %157 = vmatpush3.bf16.msra.mxu0 %v175_v4 }
   0xf   :  { %158 = vmatprep.subr.bf16.mxu0 %v180_v0 }
  0x12   :  { %159 = vmatpush3.bf16.msra.mxu0 %v176_v5 }
  0x13   :  { %160 = vmatprep.subr.bf16.mxu0 %v180_v0 }
  0x16   :  { %161 = vmatpush3.bf16.msra.mxu0 %v177_v6 }
  0x17   :  { %162 = vmatprep.subr.bf16.mxu0 %v180_v0 }
  0x1a   :  { %163 = vmatpush3.bf16.msra.mxu0 %v178_v7 }
  0x1b   :  { %164 = vmatprep.subr.bf16.mxu0 %v180_v0 }
  0x1e   :  { %165 = vmatpush3.bf16.msra.mxu0 %v179_v8 }
  0x21   :  { %167 = vmatmul.mubr.bf16.vlgmr.msra.gmra.mrb[0].mxu0 %v15_v9 }
  0xf4   :  { %v121_v11 = vpop.f32.mrb[0].mxu0 }
  0xf5   :  { %v122_v12 = vadd.f32 %v132_v10, %v121_v11  ;;  %v168_v13 = vpop.f32.mrb[1].mxu0 }
  0xf6   :  { %v124_v14 = vpop.f32.mrb[2].mxu0 }
  0xf7   :  { %127 = vst [vmem:[%s238_s3] sm:$0xff] %v122_v12  ;;  %v169_v15 = vpop.f32.mrb[3].mxu0 }

// kernel: multitask_rnn_forward.3
= control target key start
LH: loop header
LB: loop body
LE: loop exit
PB: predicated region body
PF: predicated region fallthrough
CT: control target
= control target key end

     0   :  { %s414_s1 = inlined_call_operand.vmem [shape: bf16[128,128], index: 1, kind: input, shape index: {}]   ;;  %s415_s0 = inlined_call_operand.vmem [shape: bf16[64,128], index: 0, kind: input, shape index: {}]   ;;  %s416_s2 = inlined_call_operand.vmem [shape: f32[1,128], index: 2, kind: input, shape index: {}]   ;;  %s417_s3 = inlined_call_operand.vmem [shape: bf16[64,128], index: 3, kind: output, shape index: {}]  }
   0x1   :  { %v331_v0 = vld [vmem:[%s414_s1] sm:$0xff]   ;;  %v332_v1 = vld [vmem:[%s414_s1 + $0x8] sm:$0xff]   ;;  %v333_v2 = vld [vmem:[%s414_s1 + $0x10] sm:$0xff]  }
   0x2   :  { %291 = vmatprep.subr.bf16.mxu0 %v331_v0  ;;  %315 = vmatprep.subr.bf16.mxu1 %v331_v0  ;;  %v334_v3 = vld [vmem:[%s414_s1 + $0x18] sm:$0xff]   ;;  %v339_v4 = vld [vmem:[%s415_s0] sm:$0xff]   ;;  %v340_v5 = vld [vmem:[%s415_s0 + $0x10] sm:$0xff]  }
   0x3   :  { %292 = vmatpush3.bf16.msra.mxu0 %v331_v0  ;;  %323 = vmatpush3.bf16.msra.mxu1 %v331_v0  ;;  %v335_v6 = vld [vmem:[%s414_s1 + $0x20] sm:$0xff]   ;;  %v336_v7 = vld [vmem:[%s414_s1 + $0x28] sm:$0xff]   ;;  %v337_v8 = vld [vmem:[%s414_s1 + $0x30] sm:$0xff]  }
   0x4   :  { %293 = vmatprep.subr.bf16.mxu0 %v332_v1  ;;  %316 = vmatprep.subr.bf16.mxu1 %v332_v1  ;;  %v338_v9 = vld [vmem:[%s414_s1 + $0x38] sm:$0xff]   ;;  %v341_v10 = vld [vmem:[%s415_s0 + $0x8] sm:$0xff]   ;;  %v227_v13 = vld [vmem:[%s416_s2] ss:$0 sm:$0xff] }
   0x5   :  { %307 = vmatprep.mubr.bf16.mxu0 %v339_v4  ;;  %311 = vmatprep.mubr.bf16.mxu1 %v340_v5  ;;  %v342_v11 = vld [vmem:[%s415_s0 + $0x18] sm:$0xff]  }
   0x7   :  { %294 = vmatpush3.bf16.msra.mxu0 %v332_v1  ;;  %324 = vmatpush3.bf16.msra.mxu1 %v332_v1 }
   0x8   :  { %295 = vmatprep.subr.bf16.mxu0 %v333_v2  ;;  %317 = vmatprep.subr.bf16.mxu1 %v333_v2 }
   0xb   :  { %296 = vmatpush3.bf16.msra.mxu0 %v333_v2  ;;  %325 = vmatpush3.bf16.msra.mxu1 %v333_v2 }
   0xc   :  { %297 = vmatprep.subr.bf16.mxu0 %v334_v3  ;;  %318 = vmatprep.subr.bf16.mxu1 %v334_v3 }
   0xf   :  { %298 = vmatpush3.bf16.msra.mxu0 %v334_v3  ;;  %326 = vmatpush3.bf16.msra.mxu1 %v334_v3 }
  0x10   :  { %299 = vmatprep.subr.bf16.mxu0 %v335_v6  ;;  %319 = vmatprep.subr.bf16.mxu1 %v335_v6 }
  0x13   :  { %300 = vmatpush3.bf16.msra.mxu0 %v335_v6  ;;  %327 = vmatpush3.bf16.msra.mxu1 %v335_v6 }
  0x14   :  { %301 = vmatprep.subr.bf16.mxu0 %v336_v7  ;;  %320 = vmatprep.subr.bf16.mxu1 %v336_v7 }
  0x17   :  { %302 = vmatpush3.bf16.msra.mxu0 %v336_v7  ;;  %328 = vmatpush3.bf16.msra.mxu1 %v336_v7 }
  0x18   :  { %303 = vmatprep.subr.bf16.mxu0 %v337_v8  ;;  %321 = vmatprep.subr.bf16.mxu1 %v337_v8 }
  0x1b   :  { %304 = vmatpush3.bf16.msra.mxu0 %v337_v8  ;;  %329 = vmatpush3.bf16.msra.mxu1 %v337_v8 }
  0x1c   :  { %305 = vmatprep.subr.bf16.mxu0 %v338_v9  ;;  %322 = vmatprep.subr.bf16.mxu1 %v338_v9 }
  0x1f   :  { %306 = vmatpush3.bf16.msra.mxu0 %v338_v9  ;;  %330 = vmatpush3.bf16.msra.mxu1 %v338_v9 }
  0x22   :  { %308 = vmatmul.mubr.bf16.vlgmr.msra.gmra.mrb[0].mxu0 %v341_v10  ;;  %312 = vmatmul.mubr.bf16.vlgmr.msra.gmra.mrb[0].mxu1 %v342_v11 }
  0xf5   :  { %v309_v12 = vpop.f32.mrb[0].mxu0  ;;  %v313_v14 = vpop.f32.mrb[0].mxu1 }
  0xf6   :  { %v152_v15 = vpop.f32.mrb[1].mxu0  ;;  %v168_v16 = vpop.f32.mrb[1].mxu1  ;;  %v161_v19 = vadd.f32 %v309_v12, %v227_v13  ;;  %v177_v20 = vadd.f32 %v313_v14, %v227_v13 }
  0xf7   :  { %v310_v17 = vpop.f32.mrb[2].mxu0  ;;  %v314_v18 = vpop.f32.mrb[2].mxu1  ;;  %v153_v25 = vadd.f32 %v227_v13, %v152_v15  ;;  %v169_v26 = vadd.f32 %v227_v13, %v168_v16 }
  0xf8   :  { %v164_v21 = vadd.f32 %v310_v17, %v227_v13  ;;  %v180_v22 = vadd.f32 %v314_v18, %v227_v13  ;;  %v155_v23 = vpop.f32.mrb[3].mxu0  ;;  %v171_v24 = vpop.f32.mrb[3].mxu1 }
  0xf9   :  { %v156_v27 = vadd.f32 %v227_v13, %v155_v23  ;;  %v172_v28 = vadd.f32 %v227_v13, %v171_v24 }
  0xfa   :  { %v264_v29 = vpack.c.bf16 %v164_v21, %v161_v19  ;;  %v274_v30 = vpack.c.bf16 %v180_v22, %v177_v20 }
  0xfb   :  { %v259_v31 = vpack.c.bf16 %v156_v27, %v153_v25  ;;  %v269_v32 = vpack.c.bf16 %v172_v28, %v169_v26 }
  0xfc   :  { %276 = vst [vmem:[%s417_s3 + $0x8] sm:$0xff] %v264_v29   ;;  %278 = vst [vmem:[%s417_s3 + $0x18] sm:$0xff] %v274_v30  }
  0xfd   :  { %260 = vst [vmem:[%s417_s3] sm:$0xff] %v259_v31   ;;  %277 = vst [vmem:[%s417_s3 + $0x10] sm:$0xff] %v269_v32  }

// kernel: multitask_rnn_forward.4
= control target key start
LH: loop header
LB: loop body
LE: loop exit
PB: predicated region body
PF: predicated region fallthrough
CT: control target
= control target key end

     0   :  { %v1308_v0 = vmov 0.0   ;;  %vm1309_vm0 = vmmov 0   ;;  %v1310_v13 = vmov 0.0|0.0   ;;  %s1616_s1 = inlined_call_operand.vmem [shape: bf16[128,128], index: 1, kind: input, shape index: {}]   ;;  %s1617_s0 = inlined_call_operand.vmem [shape: bf16[8,8,128], index: 0, kind: input, shape index: {}]   ;;  %s1618_s2 = inlined_call_operand.vmem [shape: bf16[8,128], index: 2, kind: output, shape index: {}]  }
   0x1   :  { %1065 = vmatprep.subr.bf16.mxu0 %v1308_v0  ;;  %v1228_v1 = vld [vmem:[%s1616_s1] sm:$0xff]   ;;  %1081 = vmatprep.mubr.msk.bf16.mxu0 %vm1309_vm0, %v1308_v0  ;;  %v1229_v2 = vld [vmem:[%s1616_s1 + $0x8] sm:$0xff]   ;;  %v1230_v3 = vld [vmem:[%s1616_s1 + $0x10] sm:$0xff]  }
   0x2   :  { %1085 = vmatprep.subr.bf16.mxu1 %v1308_v0  ;;  %1101 = vmatprep.mubr.msk.bf16.mxu1 %vm1309_vm0, %v1308_v0  ;;  %v1236_v4 = vld [vmem:[%s1616_s1] sm:$0xff]   ;;  %v1231_v5 = vld [vmem:[%s1616_s1 + $0x18] sm:$0xff]   ;;  %v1237_v6 = vld [vmem:[%s1616_s1 + $0x8] sm:$0xff]  }
   0x3   :  { %1066 = vmatpush3.bf16.msra.mxu0 %v1228_v1  ;;  %1086 = vmatpush3.bf16.msra.mxu1 %v1236_v4  ;;  %v1232_v7 = vld [vmem:[%s1616_s1 + $0x20] sm:$0xff]   ;;  %v1238_v8 = vld [vmem:[%s1616_s1 + $0x10] sm:$0xff]   ;;  %v1233_v9 = vld [vmem:[%s1616_s1 + $0x28] sm:$0xff]  }
   0x4   :  { %1067 = vmatprep.subr.bf16.mxu0 %v1308_v0  ;;  %1087 = vmatprep.subr.bf16.mxu1 %v1308_v0  ;;  %v1239_v10 = vld [vmem:[%s1616_s1 + $0x18] sm:$0xff]   ;;  %v1234_v11 = vld [vmem:[%s1616_s1 + $0x30] sm:$0xff]   ;;  %v1240_v14 = vld [vmem:[%s1616_s1 + $0x20] sm:$0xff]  }
   0x5   :  { %v1235_v12 = vld [vmem:[%s1616_s1 + $0x38] sm:$0xff]   ;;  %v1241_v15 = vld [vmem:[%s1616_s1 + $0x28] sm:$0xff]   ;;  %v1242_v16 = vld [vmem:[%s1616_s1 + $0x30] sm:$0xff]  }
   0x6   :  { %v1243_v17 = vld [vmem:[%s1616_s1 + $0x38] sm:$0xff]   ;;  %v1244_v18 = vld [vmem:[%s1616_s1] sm:$0xff]   ;;  %v1245_v19 = vld [vmem:[%s1616_s1 + $0x8] sm:$0xff]  }
   0x7   :  { %1068 = vmatpush3.bf16.msra.mxu0 %v1229_v2  ;;  %1088 = vmatpush3.bf16.msra.mxu1 %v1237_v6  ;;  %v1246_v20 = vld [vmem:[%s1616_s1 + $0x10] sm:$0xff]   ;;  %v1247_v21 = vld [vmem:[%s1616_s1 + $0x18] sm:$0xff]   ;;  %v17_v22 = vld [vmem:[%s1617_s0] sm:$0xff]  }
   0x8   :  { %1069 = vmatprep.subr.bf16.mxu0 %v1308_v0  ;;  %1089 = vmatprep.subr.bf16.mxu1 %v1308_v0  ;;  %v18_v23 = vunpack.c.l.bf16 %v17_v22  ;;  %v1248_v31 = vld [vmem:[%s1616_s1 + $0x20] sm:$0xff]   ;;  %v1249_v32 = vld [vmem:[%s1616_s1 + $0x28] sm:$0xff]   ;;  %v1250_v33 = vld [vmem:[%s1616_s1 + $0x30] sm:$0xff]   ;;  %v130_v39 = vunpack.c.h.bf16 %v17_v22 }
   0x9   :  { %v1251_v34 = vld [vmem:[%s1616_s1 + $0x38] sm:$0xff]   ;;  %v1252_v35 = vld [vmem:[%s1616_s1] sm:$0xff]   ;;  %v1253_v36 = vld [vmem:[%s1616_s1 + $0x8] sm:$0xff]  }
   0xa   :  { %v1254_v37 = vld [vmem:[%s1616_s1 + $0x10] sm:$0xff]   ;;  %v1255_v38 = vld [vmem:[%s1616_s1 + $0x18] sm:$0xff]   ;;  %v1256_v47 = vld [vmem:[%s1616_s1 + $0x20] sm:$0xff]  }
   0xb   :  { %1070 = vmatpush3.bf16.msra.mxu0 %v1230_v3  ;;  %1090 = vmatpush3.bf16.msra.mxu1 %v1238_v8  ;;  %v1257_v48 = vld [vmem:[%s1616_s1 + $0x28] sm:$0xff]   ;;  %v1258_v49 = vld [vmem:[%s1616_s1 + $0x30] sm:$0xff]   ;;  %v1259_v50 = vld [vmem:[%s1616_s1 + $0x38] sm:$0xff]  }
   0xc   :  { %1071 = vmatprep.subr.bf16.mxu0 %v1308_v0  ;;  %1091 = vmatprep.subr.bf16.mxu1 %v1308_v0  ;;  %v1260_v51 = vld [vmem:[%s1616_s1] sm:$0xff]   ;;  %v1261_v52 = vld [vmem:[%s1616_s1 + $0x8] sm:$0xff]   ;;  %v1262_v53 = vld [vmem:[%s1616_s1 + $0x10] sm:$0xff]  }
   0xd   :  { %v1263_v54 = vld [vmem:[%s1616_s1 + $0x18] sm:$0xff]   ;;  %v939_v55 = vld [vmem:[%s1617_s0 + $0x8] sm:$0xff]   ;;  %v1264_v1 = vld [vmem:[%s1616_s1 + $0x20] sm:$0xff]  }
   0xe   :  { %v242_v56 = vunpack.c.l.bf16 %v939_v55  ;;  %v1265_v2 = vld [vmem:[%s1616_s1 + $0x28] sm:$0xff]   ;;  %v1266_v3 = vld [vmem:[%s1616_s1 + $0x30] sm:$0xff]   ;;  %v1267_v4 = vld [vmem:[%s1616_s1 + $0x38] sm:$0xff]  }
   0xf   :  { %1072 = vmatpush3.bf16.msra.mxu0 %v1231_v5  ;;  %1092 = vmatpush3.bf16.msra.mxu1 %v1239_v10  ;;  %v1268_v5 = vld [vmem:[%s1616_s1] sm:$0xff]   ;;  %v1269_v6 = vld [vmem:[%s1616_s1 + $0x8] sm:$0xff]   ;;  %v1271_v8 = vld [vmem:[%s1616_s1 + $0x18] sm:$0xff]  }
  0x10   :  { %1073 = vmatprep.subr.bf16.mxu0 %v1308_v0  ;;  %1093 = vmatprep.subr.bf16.mxu1 %v1308_v0  ;;  %v1277_v22 = vld [vmem:[%s1616_s1 + $0x8] sm:$0xff]  }
  0x13   :  { %1074 = vmatpush3.bf16.msra.mxu0 %v1232_v7  ;;  %1094 = vmatpush3.bf16.msra.mxu1 %v1240_v14  ;;  %v1270_v7 = vld [vmem:[%s1616_s1 + $0x10] sm:$0xff]  }
  0x14   :  { %1075 = vmatprep.subr.bf16.mxu0 %v1308_v0  ;;  %1095 = vmatprep.subr.bf16.mxu1 %v1308_v0 }
  0x17   :  { %1076 = vmatpush3.bf16.msra.mxu0 %v1233_v9  ;;  %1096 = vmatpush3.bf16.msra.mxu1 %v1241_v15  ;;  %v354_v9 = vunpack.c.h.bf16 %v939_v55 }
  0x18   :  { %1077 = vmatprep.subr.bf16.mxu0 %v1308_v0  ;;  %1097 = vmatprep.subr.bf16.mxu1 %v1308_v0 }
  0x1b   :  { %1078 = vmatpush3.bf16.msra.mxu0 %v1234_v11  ;;  %1098 = vmatpush3.bf16.msra.mxu1 %v1242_v16 }
  0x1c   :  { %1079 = vmatprep.subr.bf16.mxu0 %v1308_v0  ;;  %1099 = vmatprep.subr.bf16.mxu1 %v1308_v0 }
  0x1f   :  { %1080 = vmatpush3.bf16.msra.mxu0 %v1235_v12  ;;  %1100 = vmatpush3.bf16.msra.mxu1 %v1243_v17  ;;  %v1272_v17 = vld [vmem:[%s1616_s1 + $0x20] sm:$0xff]  }
  0x20   :  { %1105 = vmatprep.subr.bf16.mxu0 %v1308_v0  ;;  %1125 = vmatprep.subr.bf16.mxu1 %v1308_v0 }
  0x22   :  { %1082 = vmatmul.mubr.bf16.vlgmr.msra.gmra.mrb[0].mxu0 %v1310_v13 }
  0x23   :  { %1121 = vmatprep.mubr.msk.bf16.mxu0 %vm1309_vm0, %v1308_v0  ;;  %1106 = vmatpush3.bf16.msra.mxu0 %v1244_v18  ;;  %v1273_v18 = vld [vmem:[%s1616_s1 + $0x28] sm:$0xff]  }
  0x24   :  { %1107 = vmatprep.subr.bf16.mxu0 %v1308_v0 }
  0x27   :  { %1108 = vmatpush3.bf16.msra.mxu0 %v1245_v19  ;;  %v1274_v19 = vld [vmem:[%s1616_s1 + $0x30] sm:$0xff]  }
  0x28   :  { %1109 = vmatprep.subr.bf16.mxu0 %v1308_v0 }
  0x2b   :  { %1110 = vmatpush3.bf16.msra.mxu0 %v1246_v20  ;;  %v1275_v20 = vld [vmem:[%s1616_s1 + $0x38] sm:$0xff]  }
  0x2c   :  { %1111 = vmatprep.subr.bf16.mxu0 %v1308_v0 }
  0x2f   :  { %1112 = vmatpush3.bf16.msra.mxu0 %v1247_v21  ;;  %v1276_v21 = vld [vmem:[%s1616_s1] sm:$0xff]  }
  0x30   :  { %1113 = vmatprep.subr.bf16.mxu0 %v1308_v0 }
  0x33   :  { %1114 = vmatpush3.bf16.msra.mxu0 %v1248_v31 }
  0x34   :  { %1115 = vmatprep.subr.bf16.mxu0 %v1308_v0 }
  0x37   :  { %1116 = vmatpush3.bf16.msra.mxu0 %v1249_v32 }
  0x38   :  { %1117 = vmatprep.subr.bf16.mxu0 %v1308_v0 }
  0x3b   :  { %1118 = vmatpush3.bf16.msra.mxu0 %v1250_v33 }
  0x3c   :  { %1119 = vmatprep.subr.bf16.mxu0 %v1308_v0 }
  0x3f   :  { %1120 = vmatpush3.bf16.msra.mxu0 %v1251_v34  ;;  %v1280_v34 = vld [vmem:[%s1616_s1 + $0x20] sm:$0xff]  }
  0x40   :  { %1145 = vmatprep.subr.bf16.mxu0 %v1308_v0 }
  0xf5   :  { %v119_v24 = vpop.f32.mrb[0].mxu0 }
  0xf6   :  { %v125_v25 = vadd.f32 %v119_v24, %v18_v23  ;;  %v1083_v26 = vpop.f32.mrb[1].mxu0  ;;  %v1278_v23 = vld [vmem:[%s1616_s1 + $0x10] sm:$0xff]   ;;  %v1279_v24 = vld [vmem:[%s1616_s1 + $0x18] sm:$0xff]  }
  0xf7   :  { %v122_v27 = vpop.f32.mrb[2].mxu0 }
  0xf8   :  { %1292 = vtanh.f32 %v125_v25  ;;  %v1084_v28 = vpop.f32.mrb[3].mxu0  ;;  %v957_v25 = vld [vmem:[%s1617_s0 + $0x10] sm:$0xff]  }
  0xf9   :  { %v466_v26 = vunpack.c.l.bf16 %v957_v25 }
 0x102   :  { %v1293_v29 = vpop.eup %1292 }
 0x103   :  { %v132_v30 = vpack.c.bf16 %v1293_v29, %v1293_v29 }
 0x105   :  { %1102 = vmatmul.mubr.bf16.vlgmr.msra.gmra.mrb[0].mxu1 %v132_v30 }
 0x106   :  { %1141 = vmatprep.mubr.msk.bf16.mxu1 %vm1309_vm0, %v1308_v0  ;;  %1126 = vmatpush3.bf16.msra.mxu1 %v1252_v35  ;;  %v1281_v35 = vld [vmem:[%s1616_s1 + $0x28] sm:$0xff]  }
 0x107   :  { %1127 = vmatprep.subr.bf16.mxu1 %v1308_v0 }
 0x10a   :  { %1128 = vmatpush3.bf16.msra.mxu1 %v1253_v36  ;;  %v1282_v36 = vld [vmem:[%s1616_s1 + $0x30] sm:$0xff]  }
 0x10b   :  { %1129 = vmatprep.subr.bf16.mxu1 %v1308_v0 }
 0x10e   :  { %1130 = vmatpush3.bf16.msra.mxu1 %v1254_v37  ;;  %v1283_v37 = vld [vmem:[%s1616_s1 + $0x38] sm:$0xff]  }
 0x10f   :  { %1131 = vmatprep.subr.bf16.mxu1 %v1308_v0 }
 0x112   :  { %1132 = vmatpush3.bf16.msra.mxu1 %v1255_v38  ;;  %v1284_v38 = vld [vmem:[%s1616_s1] sm:$0xff]  }
 0x113   :  { %1133 = vmatprep.subr.bf16.mxu1 %v1308_v0 }
 0x116   :  { %1134 = vmatpush3.bf16.msra.mxu1 %v1256_v47 }
 0x117   :  { %1135 = vmatprep.subr.bf16.mxu1 %v1308_v0 }
 0x11a   :  { %1136 = vmatpush3.bf16.msra.mxu1 %v1257_v48 }
 0x11b   :  { %1137 = vmatprep.subr.bf16.mxu1 %v1308_v0 }
 0x11e   :  { %1138 = vmatpush3.bf16.msra.mxu1 %v1258_v49 }
 0x11f   :  { %1139 = vmatprep.subr.bf16.mxu1 %v1308_v0 }
 0x122   :  { %1140 = vmatpush3.bf16.msra.mxu1 %v1259_v50  ;;  %v1288_v50 = vld [vmem:[%s1616_s1 + $0x20] sm:$0xff]  }
 0x123   :  { %1165 = vmatprep.subr.bf16.mxu1 %v1308_v0 }
 0x1d8   :  { %v231_v40 = vpop.f32.mrb[0].mxu1 }
 0x1d9   :  { %v237_v41 = vadd.f32 %v231_v40, %v130_v39  ;;  %v1103_v42 = vpop.f32.mrb[1].mxu1  ;;  %v1285_v39 = vld [vmem:[%s1616_s1 + $0x8] sm:$0xff]   ;;  %v1286_v40 = vld [vmem:[%s1616_s1 + $0x10] sm:$0xff]  }
 0x1da   :  { %v234_v43 = vpop.f32.mrb[2].mxu1  ;;  %v578_v42 = vunpack.c.h.bf16 %v957_v25 }
 0x1db   :  { %1294 = vtanh.f32 %v237_v41  ;;  %v1104_v44 = vpop.f32.mrb[3].mxu1  ;;  %v1287_v41 = vld [vmem:[%s1616_s1 + $0x18] sm:$0xff]  }
 0x1e5   :  { %v1295_v45 = vpop.eup %1294 }
 0x1e6   :  { %v244_v46 = vpack.c.bf16 %v1295_v45, %v1295_v45 }
 0x1e8   :  { %1122 = vmatmul.mubr.bf16.vlgmr.msra.gmra.mrb[4].mxu0 %v244_v46 }
 0x1e9   :  { %1161 = vmatprep.mubr.msk.bf16.mxu0 %vm1309_vm0, %v1308_v0  ;;  %1146 = vmatpush3.bf16.msra.mxu0 %v1260_v51  ;;  %v1289_v51 = vld [vmem:[%s1616_s1 + $0x28] sm:$0xff]  }
 0x1ea   :  { %1147 = vmatprep.subr.bf16.mxu0 %v1308_v0 }
 0x1ed   :  { %1148 = vmatpush3.bf16.msra.mxu0 %v1261_v52  ;;  %v1290_v52 = vld [vmem:[%s1616_s1 + $0x30] sm:$0xff]  }
 0x1ee   :  { %1149 = vmatprep.subr.bf16.mxu0 %v1308_v0 }
 0x1f1   :  { %1150 = vmatpush3.bf16.msra.mxu0 %v1262_v53  ;;  %v1291_v53 = vld [vmem:[%s1616_s1 + $0x38] sm:$0xff]  }
 0x1f2   :  { %1151 = vmatprep.subr.bf16.mxu0 %v1308_v0 }
 0x1f5   :  { %1152 = vmatpush3.bf16.msra.mxu0 %v1263_v54  ;;  %v975_v54 = vld [vmem:[%s1617_s0 + $0x18] sm:$0xf] }
 0x1f6   :  { %1153 = vmatprep.subr.bf16.mxu0 %v1308_v0  ;;  %v690_v55 = vunpack.c.l.bf16 %v975_v54 }
 0x1f9   :  { %1154 = vmatpush3.bf16.msra.mxu0 %v1264_v1 }
 0x1fa   :  { %1155 = vmatprep.subr.bf16.mxu0 %v1308_v0 }
 0x1fd   :  { %1156 = vmatpush3.bf16.msra.mxu0 %v1265_v2 }
 0x1fe   :  { %1157 = vmatprep.subr.bf16.mxu0 %v1308_v0 }
 0x201   :  { %1158 = vmatpush3.bf16.msra.mxu0 %v1266_v3 }
 0x202   :  { %1159 = vmatprep.subr.bf16.mxu0 %v1308_v0 }
 0x205   :  { %1160 = vmatpush3.bf16.msra.mxu0 %v1267_v4 }
 0x206   :  { %1185 = vmatprep.subr.bf16.mxu0 %v1308_v0 }
 0x2bb   :  { %v343_v57 = vpop.f32.mrb[4].mxu0 }
 0x2bc   :  { %v349_v58 = vadd.f32 %v343_v57, %v242_v56  ;;  %v1123_v59 = vpop.f32.mrb[5].mxu0 }
 0x2bd   :  { %v346_v60 = vpop.f32.mrb[6].mxu0 }
 0x2be   :  { %1296 = vtanh.f32 %v349_v58  ;;  %v1124_v61 = vpop.f32.mrb[7].mxu0 }
 0x2c8   :  { %v1297_v62 = vpop.eup %1296 }
 0x2c9   :  { %v356_v63 = vpack.c.bf16 %v1297_v62, %v1297_v62 }
 0x2cb   :  { %1142 = vmatmul.mubr.bf16.vlgmr.msra.gmra.mrb[4].mxu1 %v356_v63 }
 0x2cc   :  { %1181 = vmatprep.mubr.msk.bf16.mxu1 %vm1309_vm0, %v1308_v0  ;;  %1166 = vmatpush3.bf16.msra.mxu1 %v1268_v5 }
 0x2cd   :  { %1167 = vmatprep.subr.bf16.mxu1 %v1308_v0 }
 0x2d0   :  { %1168 = vmatpush3.bf16.msra.mxu1 %v1269_v6 }
 0x2d1   :  { %1169 = vmatprep.subr.bf16.mxu1 %v1308_v0 }
 0x2d4   :  { %1170 = vmatpush3.bf16.msra.mxu1 %v1270_v7 }
 0x2d5   :  { %1171 = vmatprep.subr.bf16.mxu1 %v1308_v0 }
 0x2d8   :  { %1172 = vmatpush3.bf16.msra.mxu1 %v1271_v8 }
 0x2d9   :  { %1173 = vmatprep.subr.bf16.mxu1 %v1308_v0 }
 0x2dc   :  { %1174 = vmatpush3.bf16.msra.mxu1 %v1272_v17 }
 0x2dd   :  { %1175 = vmatprep.subr.bf16.mxu1 %v1308_v0 }
 0x2e0   :  { %1176 = vmatpush3.bf16.msra.mxu1 %v1273_v18 }
 0x2e1   :  { %1177 = vmatprep.subr.bf16.mxu1 %v1308_v0 }
 0x2e4   :  { %1178 = vmatpush3.bf16.msra.mxu1 %v1274_v19 }
 0x2e5   :  { %1179 = vmatprep.subr.bf16.mxu1 %v1308_v0 }
 0x2e8   :  { %1180 = vmatpush3.bf16.msra.mxu1 %v1275_v20 }
 0x2e9   :  { %1205 = vmatprep.subr.bf16.mxu1 %v1308_v0 }
 0x39e   :  { %v455_v10 = vpop.f32.mrb[4].mxu1 }
 0x39f   :  { %v461_v11 = vadd.f32 %v455_v10, %v354_v9  ;;  %v1143_v12 = vpop.f32.mrb[5].mxu1 }
 0x3a0   :  { %v458_v13 = vpop.f32.mrb[6].mxu1 }
 0x3a1   :  { %1298 = vtanh.f32 %v461_v11  ;;  %v1144_v14 = vpop.f32.mrb[7].mxu1 }
 0x3ab   :  { %v1299_v15 = vpop.eup %1298 }
 0x3ac   :  { %v468_v16 = vpack.c.bf16 %v1299_v15, %v1299_v15 }
 0x3ae   :  { %1162 = vmatmul.mubr.bf16.vlgmr.msra.gmra.mrb[8].mxu0 %v468_v16 }
 0x3af   :  { %1201 = vmatprep.mubr.msk.bf16.mxu0 %vm1309_vm0, %v1308_v0  ;;  %1186 = vmatpush3.bf16.msra.mxu0 %v1276_v21 }
 0x3b0   :  { %1187 = vmatprep.subr.bf16.mxu0 %v1308_v0 }
 0x3b3   :  { %1188 = vmatpush3.bf16.msra.mxu0 %v1277_v22 }
 0x3b4   :  { %1189 = vmatprep.subr.bf16.mxu0 %v1308_v0 }
 0x3b7   :  { %1190 = vmatpush3.bf16.msra.mxu0 %v1278_v23 }
 0x3b8   :  { %1191 = vmatprep.subr.bf16.mxu0 %v1308_v0 }
 0x3bb   :  { %1192 = vmatpush3.bf16.msra.mxu0 %v1279_v24 }
 0x3bc   :  { %1193 = vmatprep.subr.bf16.mxu0 %v1308_v0 }
 0x3bf   :  { %1194 = vmatpush3.bf16.msra.mxu0 %v1280_v34 }
 0x3c0   :  { %1195 = vmatprep.subr.bf16.mxu0 %v1308_v0 }
 0x3c3   :  { %1196 = vmatpush3.bf16.msra.mxu0 %v1281_v35 }
 0x3c4   :  { %1197 = vmatprep.subr.bf16.mxu0 %v1308_v0 }
 0x3c7   :  { %1198 = vmatpush3.bf16.msra.mxu0 %v1282_v36 }
 0x3c8   :  { %1199 = vmatprep.subr.bf16.mxu0 %v1308_v0 }
 0x3cb   :  { %1200 = vmatpush3.bf16.msra.mxu0 %v1283_v37 }
 0x481   :  { %v567_v27 = vpop.f32.mrb[8].mxu0 }
 0x482   :  { %v573_v28 = vadd.f32 %v567_v27, %v466_v26  ;;  %v1163_v29 = vpop.f32.mrb[9].mxu0 }
 0x483   :  { %v570_v30 = vpop.f32.mrb[10].mxu0 }
 0x484   :  { %1300 = vtanh.f32 %v573_v28  ;;  %v1164_v31 = vpop.f32.mrb[11].mxu0 }
 0x48e   :  { %v1301_v32 = vpop.eup %1300 }
 0x48f   :  { %v580_v33 = vpack.c.bf16 %v1301_v32, %v1301_v32 }
 0x491   :  { %1182 = vmatmul.mubr.bf16.vlgmr.msra.gmra.mrb[8].mxu1 %v580_v33 }
 0x492   :  { %1221 = vmatprep.mubr.msk.bf16.mxu1 %vm1309_vm0, %v1308_v0  ;;  %1206 = vmatpush3.bf16.msra.mxu1 %v1284_v38 }
 0x493   :  { %1207 = vmatprep.subr.bf16.mxu1 %v1308_v0 }
 0x496   :  { %1208 = vmatpush3.bf16.msra.mxu1 %v1285_v39 }
 0x497   :  { %1209 = vmatprep.subr.bf16.mxu1 %v1308_v0 }
 0x49a   :  { %1210 = vmatpush3.bf16.msra.mxu1 %v1286_v40 }
 0x49b   :  { %1211 = vmatprep.subr.bf16.mxu1 %v1308_v0 }
 0x49e   :  { %1212 = vmatpush3.bf16.msra.mxu1 %v1287_v41 }
 0x49f   :  { %1213 = vmatprep.subr.bf16.mxu1 %v1308_v0 }
 0x4a2   :  { %1214 = vmatpush3.bf16.msra.mxu1 %v1288_v50 }
 0x4a3   :  { %1215 = vmatprep.subr.bf16.mxu1 %v1308_v0 }
 0x4a6   :  { %1216 = vmatpush3.bf16.msra.mxu1 %v1289_v51 }
 0x4a7   :  { %1217 = vmatprep.subr.bf16.mxu1 %v1308_v0 }
 0x4aa   :  { %1218 = vmatpush3.bf16.msra.mxu1 %v1290_v52 }
 0x4ab   :  { %1219 = vmatprep.subr.bf16.mxu1 %v1308_v0  ;;  %v984_v0 = vld [vmem:[%s1617_s0 + $0x1c] sm:$0xf] }
 0x4ac   :  { %v802_v63 = vunpack.c.l.bf16 %v984_v0 }
 0x4ae   :  { %1220 = vmatpush3.bf16.msra.mxu1 %v1291_v53 }
 0x564   :  { %v679_v43 = vpop.f32.mrb[8].mxu1 }
 0x565   :  { %v685_v44 = vadd.f32 %v679_v43, %v578_v42  ;;  %v1183_v45 = vpop.f32.mrb[9].mxu1 }
 0x566   :  { %v682_v46 = vpop.f32.mrb[10].mxu1 }
 0x567   :  { %1302 = vtanh.f32 %v685_v44  ;;  %v1184_v47 = vpop.f32.mrb[11].mxu1 }
 0x571   :  { %v1303_v48 = vpop.eup %1302 }
 0x572   :  { %v692_v49 = vpack.c.bf16 %v1303_v48, %v1303_v48 }
 0x574   :  { %1202 = vmatmul.mubr.bf16.vlgmr.msra.gmra.mrb[12].mxu0 %v692_v49 }
 0x647   :  { %v791_v56 = vpop.f32.mrb[12].mxu0 }
 0x648   :  { %v797_v57 = vadd.f32 %v791_v56, %v690_v55  ;;  %v1203_v58 = vpop.f32.mrb[13].mxu0 }
 0x649   :  { %v794_v59 = vpop.f32.mrb[14].mxu0 }
 0x64a   :  { %1304 = vtanh.f32 %v797_v57  ;;  %v1204_v60 = vpop.f32.mrb[15].mxu0 }
 0x654   :  { %v1305_v61 = vpop.eup %1304 }
 0x655   :  { %v804_v62 = vpack.c.bf16 %v1305_v61, %v1305_v61 }
 0x657   :  { %1222 = vmatmul.mubr.bf16.vlgmr.msra.gmra.mrb[12].mxu1 %v804_v62 }
 0x72a   :  { %v903_v1 = vpop.f32.mrb[12].mxu1 }
 0x72b   :  { %v909_v2 = vadd.f32 %v903_v1, %v802_v63  ;;  %v1223_v3 = vpop.f32.mrb[13].mxu1 }
 0x72c   :  { %v906_v4 = vpop.f32.mrb[14].mxu1 }
 0x72d   :  { %1306 = vtanh.f32 %v909_v2  ;;  %v1224_v5 = vpop.f32.mrb[15].mxu1 }
 0x737   :  { %v1307_v6 = vpop.eup %1306 }
 0x738   :  { %v916_v7 = vpack.c.bf16 %v1307_v6, %v1307_v6 }
 0x73a   :  { %917 = vst [vmem:[%s1618_s2] sm:$0xf] %v916_v7 }

</bundles_post_ra>
